<compile_context>
chip_gen: v7x
topology: tpu7x:2x2x1
jax: 0.10.0
libtpu: 0.0.40
codegen_flags: <defaults>
</compile_context>

<pallas_src>
import functools
import math

import numpy as np
import jax
import jax.numpy as jnp
from jax.experimental import pallas as pl
from jax.experimental.pallas import tpu as pltpu


def _half_kernel(H, W, wb_ref, x_ref, o_ref):
    """Depthwise ConvTranspose2d k=(3,3), s=(2,2), p=(1,1), out_pad=(1,1).

    x_ref:  (R, W)   rows are (b, c, j) triples, R = Cb*H
    wb_ref: (R, 10)  row-tiled 9 taps + bias
    o_ref:  (R, 4W)  lane = pr*2W + 2k + pc  -> flat layout is already NCHW
    """
    R = x_ref.shape[0]
    f32 = jnp.float32
    x = x_ref[...].astype(f32)                    # (R, W)
    wb = wb_ref[...].astype(f32)                  # (R, 10)

    # In-kernel masks from iota (no extra DMA stream); they also kill the
    # wrap-around of the rolls below (j == H-1 rows, k == W-1 columns).
    row_id = jax.lax.broadcasted_iota(jnp.int32, (R, 1), 0)
    col_id = jax.lax.broadcasted_iota(jnp.int32, (1, W), 1)
    rowmask = jnp.where(row_id % H != H - 1, f32(1), f32(0))   # 0 at j == H-1
    colmask = jnp.where(col_id != W - 1, f32(1), f32(0))       # 0 at k == W-1

    # Wrap-around shifts + mask (no freshly materialised zeros tensor).
    # TODO(synk): pltpu.roll would pin these onto the XLU slot; jnp.roll is
    # kept for its unambiguous shift direction (compute has plenty of slack).
    x_h = jnp.roll(x, -1, axis=0) * rowmask       # x[j+1, k  ]
    x_w = jnp.roll(x, -1, axis=1) * colmask       # x[j,   k+1]
    x_hw = jnp.roll(x_h, -1, axis=1) * colmask    # x[j+1, k+1]

    def w(t):
        return wb[:, t:t + 1]                     # (R, 1) -> lane broadcast

    bias = wb[:, 9:10]

    # Polyphase parity planes (output row parity, output col parity).
    p00 = x * w(4)
    p01 = x_w * w(3) + x * w(5)
    p10 = x_h * w(1) + x * w(7)
    p11 = x_hw * w(0) + x_h * w(2) + x_w * w(6) + x * w(8)

    # Column interleave on the otherwise-idle MXU: 0/1 scatter matrices
    # s[k, pr*2W + 2k + pc] = 1, generated in-kernel from iota.
    ri = jax.lax.broadcasted_iota(jnp.int32, (W, 4 * W), 0)
    ci = jax.lax.broadcasted_iota(jnp.int32, (W, 4 * W), 1)

    def scatter(p, offset):
        s = jnp.where(ci == 2 * ri + offset, f32(1), f32(0))
        return jnp.dot(p, s, preferred_element_type=f32)

    out = (scatter(p00, 0) + scatter(p01, 1)
           + scatter(p10, 2 * W) + scatter(p11, 2 * W + 1) + bias)
    o_ref[...] = out.astype(o_ref.dtype)          # single lane-dense store


def _timepreserve_kernel(H, wb_ref, x_ref, o_ref):
    """Depthwise ConvTranspose2d k=(3,1), s=(2,1), p=(1,0), out_pad=(1,0).

    o_ref: (R, 2W), lane = pr*W + k  -> flat layout is already NCHW.
    """
    R = x_ref.shape[0]
    f32 = jnp.float32
    x = x_ref[...].astype(f32)                    # (R, W)
    wb = wb_ref[...].astype(f32)                  # (R, 4): 3 taps + bias
    row_id = jax.lax.broadcasted_iota(jnp.int32, (R, 1), 0)
    rowmask = jnp.where(row_id % H != H - 1, f32(1), f32(0))
    x_h = jnp.roll(x, -1, axis=0) * rowmask       # x[j+1, k]
    bias = wb[:, 3:4]
    even = x * wb[:, 1:2] + bias                  # out[2j,   k]
    odd = x_h * wb[:, 0:1] + x * wb[:, 2:3] + bias  # out[2j+1, k]
    o_ref[...] = jnp.concatenate([even, odd], axis=1).astype(o_ref.dtype)


def _vmem_budget_bytes():
    """(per-step live-block budget, vmem_limit_bytes), sized per TPU gen."""
    cap = 64 * 1024 * 1024
    try:
        cap = getattr(pltpu.get_tpu_info(), "vmem_capacity_bytes", cap)
    except Exception:
        pass
    if cap >= 100 * 1024 * 1024:          # v5e / v6e: 128 MiB physical VMEM
        return 12 * 1024 * 1024, 96 * 1024 * 1024
    return 6 * 1024 * 1024, 48 * 1024 * 1024      # v7x-class: 64 MiB physical


def _pick_channel_block(BC, H, bytes_per_channel, budget_bytes):
    """Largest channel block Cb over the merged B*C axis such that it divides
    B*C, keeps Cb*H a multiple of 8 (or the full row count), fits the
    double-buffered VMEM budget, and leaves >= 2 grid steps when possible so
    both v7x TensorCores get work."""
    legal = [cb for cb in range(1, BC + 1)
             if BC % cb == 0 and ((cb * H) % 8 == 0 or cb == BC)]
    fitting = [cb for cb in legal if cb * bytes_per_channel <= budget_bytes]
    pool = fitting if fitting else [min(legal)]
    multi = [cb for cb in pool if BC // cb >= 2]
    return max(multi) if multi else max(pool)


class LearnedUpSample:
    """Pallas TPU port of the PyTorch LearnedUpSample module (forward only)."""

    def __init__(self, layer_type, dim_in, key=None):
        self.layer_type = layer_type
        self.dim_in = dim_in
        self.weight = None
        self.bias = None
        if layer_type == 'none':
            return
        if layer_type == 'timepreserve':
            k = (3, 1)
        elif layer_type == 'half':
            k = (3, 3)
        else:
            raise RuntimeError(
                'Got unexpected upsampletype %s, expected is [none, timepreserve, half]'
                % layer_type)
        key = jax.random.PRNGKey(42) if key is None else key
        kw_, kb_ = jax.random.split(key)
        # groups == dim_in, so in_channels/groups == 1 ; deterministic init.
        bound = 1.0 / math.sqrt(k[0] * k[1])
        self.weight = jax.random.uniform(kw_, (dim_in, 1, k[0], k[1]),
                                         jnp.float32, -bound, bound)
        self.bias = jax.random.uniform(kb_, (dim_in,), jnp.float32, -bound, bound)

    def __call__(self, x):
        if self.layer_type == 'none':
            return x                       # nn.Identity passthrough
        B, C, H, W = x.shape
        assert C == self.dim_in
        BC = B * C
        # Rows = (b, c, j) triples; free reshape of contiguous NCHW.
        x_rows = x.reshape(BC * H, W)

        if self.layer_type == 'half':
            taps = self.weight.reshape(C, 9)
            ow = 4 * W
            kern = functools.partial(_half_kernel, H, W)
        else:  # 'timepreserve'
            taps = self.weight.reshape(C, 3)
            ow = 2 * W
            kern = functools.partial(_timepreserve_kernel, H)

        wb = jnp.concatenate([taps.astype(jnp.float32),
                              self.bias.reshape(C, 1).astype(jnp.float32)],
                             axis=1)                               # (C, nt)
        nt = wb.shape[1]
        # Row-tiled taps+bias (tiny vs activations): per-row weights become a
        # plain (R, 1) lane broadcast inside the kernel.
        wb_rows = jnp.repeat(jnp.tile(wb, (B, 1)), H, axis=0)      # (BC*H, nt)

        budget, vmem_limit = _vmem_budget_bytes()
        lane_pad = lambda n: -(-n // 128) * 128
        # Double-buffered VMEM bytes per channel (all H rows, real dtypes,
        # lane-padded as Mosaic lays the blocks out).
        bpc = 2 * H * (lane_pad(W) * x.dtype.itemsize
                       + lane_pad(ow) * x.dtype.itemsize
                       + lane_pad(nt) * 4)
        Cb = _pick_channel_block(BC, H, bpc, budget)
        R = Cb * H
        G = BC // Cb

        out_rows = pl.pallas_call(
            kern,
            out_shape=jax.ShapeDtypeStruct((BC * H, ow), x.dtype),
            grid=(G,),
            in_specs=[
                pl.BlockSpec((R, nt), lambda g: (g, 0)),   # row-tiled taps+bias
                pl.BlockSpec((R, W), lambda g: (g, 0)),    # input row slab
            ],
            out_specs=pl.BlockSpec((R, ow), lambda g: (g, 0)),
            compiler_params=pltpu.CompilerParams(
                dimension_semantics=("parallel",),
                vmem_limit_bytes=vmem_limit),
        )(wb_rows, x_rows)

        # Kernel output is already interleaved NCHW: reshapes below are free.
        if self.layer_type == 'half':
            return out_rows.reshape(B, C, 2 * H, 2 * W)
        return out_rows.reshape(B, C, 2 * H, W)


def _ref_conv_transpose_depthwise(x, weight, bias, stride, padding, output_padding):
    """Pure-JAX reference: grouped ConvTranspose2d == dilated conv w/ flipped kernel."""
    C = x.shape[1]
    kh, kw = weight.shape[-2:]
    sh, sw = stride
    ph, pw = padding
    oph, opw = output_padding
    rhs = jnp.flip(weight, axis=(-2, -1))                # (C, 1, kh, kw)
    y = jax.lax.conv_general_dilated(
        x, rhs,
        window_strides=(1, 1),
        padding=((kh - 1 - ph, kh - 1 - ph + oph),
                 (kw - 1 - pw, kw - 1 - pw + opw)),
        lhs_dilation=(sh, sw),
        dimension_numbers=('NCHW', 'OIHW', 'NCHW'),
        feature_group_count=C,
        precision=jax.lax.Precision.HIGHEST)
    return y + bias.reshape(1, C, 1, 1)


if __name__ == "__main__":
    key = jax.random.PRNGKey(0)
    kx, kp1, kp2 = jax.random.split(key, 3)
    B, C, H, W = 2, 4, 16, 16
    x = jax.random.normal(kx, (B, C, H, W), jnp.float32)

    # layer_type == 'half'  (2x upsample in both spatial dims)
    m_half = LearnedUpSample('half', C, key=kp1)
    y_half = jax.block_until_ready(m_half(x))
    assert y_half.shape == (B, C, 2 * H, 2 * W)
    y_ref = _ref_conv_transpose_depthwise(x, m_half.weight, m_half.bias,
                                          (2, 2), (1, 1), (1, 1))
    # MXU scatter matmuls may use TPU-default (bf16-pass) f32 matmul precision,
    # hence the slightly looser tolerance; any indexing/tap bug would be O(1).
    np.testing.assert_allclose(np.asarray(y_half), np.asarray(y_ref),
                               atol=2e-3, rtol=2e-3)

    # layer_type == 'timepreserve'  (2x upsample in H only, no MXU involved)
    m_tp = LearnedUpSample('timepreserve', C, key=kp2)
    y_tp = jax.block_until_ready(m_tp(x))
    assert y_tp.shape == (B, C, 2 * H, W)
    y_ref_tp = _ref_conv_transpose_depthwise(x, m_tp.weight, m_tp.bias,
                                             (2, 1), (1, 0), (1, 0))
    np.testing.assert_allclose(np.asarray(y_tp), np.asarray(y_ref_tp),
                               atol=1e-4, rtol=1e-4)

    # layer_type == 'none' (identity)
    m_none = LearnedUpSample('none', C)
    y_none = jax.block_until_ready(m_none(x))
    assert np.allclose(np.asarray(y_none), np.asarray(x))

    print("KERNEL_OK")
</pallas_src>

<mosaic_0001>
module attributes {stable_mosaic.version = 11 : i64} {
  func.func @_half_kernel(%arg0: i32, %arg1: memref<64x10xf32, #tpu.memory_space<vmem>>, %arg2: memref<64x16xf32, #tpu.memory_space<vmem>>, %arg3: memref<64x64xf32, #tpu.memory_space<vmem>>) attributes {dimension_semantics = [#tpu.dimension_semantics<parallel>], iteration_bounds = array<i64: 2>, scalar_prefetch = 0 : i64, scratch_operands = 0 : i64, tpu.core_type = #tpu.core_type<tc>, window_params = [{transform_indices = @transform_0, window_bounds = array<i64: 64, 10>}, {transform_indices = @transform_1, window_bounds = array<i64: 64, 16>}, {transform_indices = @transform_2, window_bounds = array<i64: 64, 64>}]} {
    %c0 = arith.constant 0 : index
    %c0_0 = arith.constant 0 : index
    %0 = vector.load %arg2[%c0, %c0_0] : memref<64x16xf32, #tpu.memory_space<vmem>>, vector<64x16xf32>
    %c0_1 = arith.constant 0 : index
    %c0_2 = arith.constant 0 : index
    %1 = vector.load %arg1[%c0_1, %c0_2] : memref<64x10xf32, #tpu.memory_space<vmem>>, vector<64x10xf32>
    %2 = tpu.iota {dimensions = array<i32: 0>} : vector<64x1xi32>
    %3 = tpu.iota {dimensions = array<i32: 1>} : vector<1x16xi32>
    %c16_i32 = arith.constant 16 : i32
    %c0_i32 = arith.constant 0 : i32
    %4 = arith.cmpi eq, %c16_i32, %c0_i32 : i32
    %c1_i32 = arith.constant 1 : i32
    %5 = arith.select %4, %c1_i32, %c16_i32 : i32
    %6 = vector.broadcast %5 : i32 to vector<64x1xi32>
    %7 = arith.remsi %2, %6 : vector<64x1xi32>
    %c0_i32_3 = arith.constant 0 : i32
    %8 = vector.broadcast %c0_i32_3 : i32 to vector<64x1xi32>
    %9 = arith.cmpi ne, %7, %8 : vector<64x1xi32>
    %c0_i32_4 = arith.constant 0 : i32
    %10 = vector.broadcast %c0_i32_4 : i32 to vector<64x1xi32>
    %11 = arith.cmpi slt, %7, %10 : vector<64x1xi32>
    %c0_i32_5 = arith.constant 0 : i32
    %12 = arith.cmpi slt, %5, %c0_i32_5 : i32
    %13 = vector.broadcast %12 : i1 to vector<64x1xi1>
    %14 = vector.broadcast %13 : vector<64x1xi1> to vector<64x1xi1>
    %15 = arith.xori %11, %14 : vector<64x1xi1>
    %16 = arith.andi %15, %9 : vector<64x1xi1>
    %17 = vector.broadcast %5 : i32 to vector<64x1xi32>
    %18 = arith.addi %7, %17 : vector<64x1xi32>
    %19 = arith.select %16, %18, %7 : vector<64x1xi1>, vector<64x1xi32>
    %c15_i32 = arith.constant 15 : i32
    %20 = vector.broadcast %c15_i32 : i32 to vector<64x1xi32>
    %21 = arith.cmpi ne, %19, %20 : vector<64x1xi32>
    %cst = arith.constant 1.000000e+00 : f32
    %cst_6 = arith.constant 0.000000e+00 : f32
    %22 = vector.broadcast %cst : f32 to vector<64x1xf32>
    %23 = vector.broadcast %cst_6 : f32 to vector<64x1xf32>
    %24 = arith.select %21, %22, %23 : vector<64x1xi1>, vector<64x1xf32>
    %c15_i32_7 = arith.constant 15 : i32
    %25 = vector.broadcast %c15_i32_7 : i32 to vector<1x16xi32>
    %26 = arith.cmpi ne, %3, %25 : vector<1x16xi32>
    %cst_8 = arith.constant 1.000000e+00 : f32
    %cst_9 = arith.constant 0.000000e+00 : f32
    %27 = vector.broadcast %cst_8 : f32 to vector<1x16xf32>
    %28 = vector.broadcast %cst_9 : f32 to vector<1x16xf32>
    %29 = arith.select %26, %27, %28 : vector<1x16xi1>, vector<1x16xf32>
    %30 = vector.extract_strided_slice %0 {offsets = [1, 0], sizes = [63, 16], strides = [1, 1]} : vector<64x16xf32> to vector<63x16xf32>
    %31 = vector.extract_strided_slice %0 {offsets = [0, 0], sizes = [1, 16], strides = [1, 1]} : vector<64x16xf32> to vector<1x16xf32>
    %32 = tpu.concatenate %30, %31 in 0 : vector<63x16xf32>, vector<1x16xf32> -> vector<64x16xf32>
    %33 = vector.broadcast %24 : vector<64x1xf32> to vector<64x16xf32>
    %34 = arith.mulf %32, %33 : vector<64x16xf32>
    %35 = vector.extract_strided_slice %0 {offsets = [0, 1], sizes = [64, 15], strides = [1, 1]} : vector<64x16xf32> to vector<64x15xf32>
    %36 = vector.extract_strided_slice %0 {offsets = [0, 0], sizes = [64, 1], strides = [1, 1]} : vector<64x16xf32> to vector<64x1xf32>
    %37 = tpu.concatenate %35, %36 in 1 : vector<64x15xf32>, vector<64x1xf32> -> vector<64x16xf32>
    %38 = vector.broadcast %29 : vector<1x16xf32> to vector<64x16xf32>
    %39 = arith.mulf %37, %38 : vector<64x16xf32>
    %40 = vector.extract_strided_slice %34 {offsets = [0, 1], sizes = [64, 15], strides = [1, 1]} : vector<64x16xf32> to vector<64x15xf32>
    %41 = vector.extract_strided_slice %34 {offsets = [0, 0], sizes = [64, 1], strides = [1, 1]} : vector<64x16xf32> to vector<64x1xf32>
    %42 = tpu.concatenate %40, %41 in 1 : vector<64x15xf32>, vector<64x1xf32> -> vector<64x16xf32>
    %43 = vector.broadcast %29 : vector<1x16xf32> to vector<64x16xf32>
    %44 = arith.mulf %42, %43 : vector<64x16xf32>
    %45 = vector.extract_strided_slice %1 {offsets = [0, 9], sizes = [64, 1], strides = [1, 1]} : vector<64x10xf32> to vector<64x1xf32>
    %46 = vector.extract_strided_slice %1 {offsets = [0, 4], sizes = [64, 1], strides = [1, 1]} : vector<64x10xf32> to vector<64x1xf32>
    %47 = vector.broadcast %46 : vector<64x1xf32> to vector<64x16xf32>
    %48 = arith.mulf %0, %47 : vector<64x16xf32>
    %49 = vector.extract_strided_slice %1 {offsets = [0, 3], sizes = [64, 1], strides = [1, 1]} : vector<64x10xf32> to vector<64x1xf32>
    %50 = vector.broadcast %49 : vector<64x1xf32> to vector<64x16xf32>
    %51 = arith.mulf %39, %50 : vector<64x16xf32>
    %52 = vector.extract_strided_slice %1 {offsets = [0, 5], sizes = [64, 1], strides = [1, 1]} : vector<64x10xf32> to vector<64x1xf32>
    %53 = vector.broadcast %52 : vector<64x1xf32> to vector<64x16xf32>
    %54 = arith.mulf %0, %53 : vector<64x16xf32>
    %55 = arith.addf %51, %54 : vector<64x16xf32>
    %56 = vector.extract_strided_slice %1 {offsets = [0, 1], sizes = [64, 1], strides = [1, 1]} : vector<64x10xf32> to vector<64x1xf32>
    %57 = vector.broadcast %56 : vector<64x1xf32> to vector<64x16xf32>
    %58 = arith.mulf %34, %57 : vector<64x16xf32>
    %59 = vector.extract_strided_slice %1 {offsets = [0, 7], sizes = [64, 1], strides = [1, 1]} : vector<64x10xf32> to vector<64x1xf32>
    %60 = vector.broadcast %59 : vector<64x1xf32> to vector<64x16xf32>
    %61 = arith.mulf %0, %60 : vector<64x16xf32>
    %62 = arith.addf %58, %61 : vector<64x16xf32>
    %63 = vector.extract_strided_slice %1 {offsets = [0, 0], sizes = [64, 1], strides = [1, 1]} : vector<64x10xf32> to vector<64x1xf32>
    %64 = vector.broadcast %63 : vector<64x1xf32> to vector<64x16xf32>
    %65 = arith.mulf %44, %64 : vector<64x16xf32>
    %66 = vector.extract_strided_slice %1 {offsets = [0, 2], sizes = [64, 1], strides = [1, 1]} : vector<64x10xf32> to vector<64x1xf32>
    %67 = vector.broadcast %66 : vector<64x1xf32> to vector<64x16xf32>
    %68 = arith.mulf %34, %67 : vector<64x16xf32>
    %69 = arith.addf %65, %68 : vector<64x16xf32>
    %70 = vector.extract_strided_slice %1 {offsets = [0, 6], sizes = [64, 1], strides = [1, 1]} : vector<64x10xf32> to vector<64x1xf32>
    %71 = vector.broadcast %70 : vector<64x1xf32> to vector<64x16xf32>
    %72 = arith.mulf %39, %71 : vector<64x16xf32>
    %73 = arith.addf %69, %72 : vector<64x16xf32>
    %74 = vector.extract_strided_slice %1 {offsets = [0, 8], sizes = [64, 1], strides = [1, 1]} : vector<64x10xf32> to vector<64x1xf32>
    %75 = vector.broadcast %74 : vector<64x1xf32> to vector<64x16xf32>
    %76 = arith.mulf %0, %75 : vector<64x16xf32>
    %77 = arith.addf %73, %76 : vector<64x16xf32>
    %78 = tpu.iota {dimensions = array<i32: 0>} : vector<16x64xi32>
    %79 = tpu.iota {dimensions = array<i32: 1>} : vector<16x64xi32>
    %c2_i32 = arith.constant 2 : i32
    %80 = vector.broadcast %c2_i32 : i32 to vector<16x64xi32>
    %81 = arith.muli %80, %78 : vector<16x64xi32>
    %c0_i32_10 = arith.constant 0 : i32
    %82 = vector.broadcast %c0_i32_10 : i32 to vector<16x64xi32>
    %83 = arith.addi %81, %82 : vector<16x64xi32>
    %84 = arith.cmpi eq, %79, %83 : vector<16x64xi32>
    %cst_11 = arith.constant 1.000000e+00 : f32
    %cst_12 = arith.constant 0.000000e+00 : f32
    %85 = vector.broadcast %cst_11 : f32 to vector<16x64xf32>
    %86 = vector.broadcast %cst_12 : f32 to vector<16x64xf32>
    %87 = arith.select %84, %85, %86 : vector<16x64xi1>, vector<16x64xf32>
    %cst_13 = arith.constant dense<0.000000e+00> : vector<64x64xf32>
    %88 = tpu.matmul %48, %87, %cst_13 {dimension_numbers = #tpu.dot_dimension_numbers<[1], [0], [0], [1], [0, 0, 1, 1], [], []>} : vector<64x16xf32>, vector<16x64xf32>, vector<64x64xf32> -> vector<64x64xf32>
    %c2_i32_14 = arith.constant 2 : i32
    %89 = vector.broadcast %c2_i32_14 : i32 to vector<16x64xi32>
    %90 = arith.muli %89, %78 : vector<16x64xi32>
    %c1_i32_15 = arith.constant 1 : i32
    %91 = vector.broadcast %c1_i32_15 : i32 to vector<16x64xi32>
    %92 = arith.addi %90, %91 : vector<16x64xi32>
    %93 = arith.cmpi eq, %79, %92 : vector<16x64xi32>
    %cst_16 = arith.constant 1.000000e+00 : f32
    %cst_17 = arith.constant 0.000000e+00 : f32
    %94 = vector.broadcast %cst_16 : f32 to vector<16x64xf32>
    %95 = vector.broadcast %cst_17 : f32 to vector<16x64xf32>
    %96 = arith.select %93, %94, %95 : vector<16x64xi1>, vector<16x64xf32>
    %cst_18 = arith.constant dense<0.000000e+00> : vector<64x64xf32>
    %97 = tpu.matmul %55, %96, %cst_18 {dimension_numbers = #tpu.dot_dimension_numbers<[1], [0], [0], [1], [0, 0, 1, 1], [], []>} : vector<64x16xf32>, vector<16x64xf32>, vector<64x64xf32> -> vector<64x64xf32>
    %98 = arith.addf %88, %97 : vector<64x64xf32>
    %c2_i32_19 = arith.constant 2 : i32
    %99 = vector.broadcast %c2_i32_19 : i32 to vector<16x64xi32>
    %100 = arith.muli %99, %78 : vector<16x64xi32>
    %c32_i32 = arith.constant 32 : i32
    %101 = vector.broadcast %c32_i32 : i32 to vector<16x64xi32>
    %102 = arith.addi %100, %101 : vector<16x64xi32>
    %103 = arith.cmpi eq, %79, %102 : vector<16x64xi32>
    %cst_20 = arith.constant 1.000000e+00 : f32
    %cst_21 = arith.constant 0.000000e+00 : f32
    %104 = vector.broadcast %cst_20 : f32 to vector<16x64xf32>
    %105 = vector.broadcast %cst_21 : f32 to vector<16x64xf32>
    %106 = arith.select %103, %104, %105 : vector<16x64xi1>, vector<16x64xf32>
    %cst_22 = arith.constant dense<0.000000e+00> : vector<64x64xf32>
    %107 = tpu.matmul %62, %106, %cst_22 {dimension_numbers = #tpu.dot_dimension_numbers<[1], [0], [0], [1], [0, 0, 1, 1], [], []>} : vector<64x16xf32>, vector<16x64xf32>, vector<64x64xf32> -> vector<64x64xf32>
    %108 = arith.addf %98, %107 : vector<64x64xf32>
    %c2_i32_23 = arith.constant 2 : i32
    %109 = vector.broadcast %c2_i32_23 : i32 to vector<16x64xi32>
    %110 = arith.muli %109, %78 : vector<16x64xi32>
    %c33_i32 = arith.constant 33 : i32
    %111 = vector.broadcast %c33_i32 : i32 to vector<16x64xi32>
    %112 = arith.addi %110, %111 : vector<16x64xi32>
    %113 = arith.cmpi eq, %79, %112 : vector<16x64xi32>
    %cst_24 = arith.constant 1.000000e+00 : f32
    %cst_25 = arith.constant 0.000000e+00 : f32
    %114 = vector.broadcast %cst_24 : f32 to vector<16x64xf32>
    %115 = vector.broadcast %cst_25 : f32 to vector<16x64xf32>
    %116 = arith.select %113, %114, %115 : vector<16x64xi1>, vector<16x64xf32>
    %cst_26 = arith.constant dense<0.000000e+00> : vector<64x64xf32>
    %117 = tpu.matmul %77, %116, %cst_26 {dimension_numbers = #tpu.dot_dimension_numbers<[1], [0], [0], [1], [0, 0, 1, 1], [], []>} : vector<64x16xf32>, vector<16x64xf32>, vector<64x64xf32> -> vector<64x64xf32>
    %118 = arith.addf %108, %117 : vector<64x64xf32>
    %119 = vector.broadcast %45 : vector<64x1xf32> to vector<64x64xf32>
    %120 = arith.addf %118, %119 : vector<64x64xf32>
    %c0_27 = arith.constant 0 : index
    %c0_28 = arith.constant 0 : index
    %121 = vector.load %arg3[%c0_27, %c0_28] : memref<64x64xf32, #tpu.memory_space<vmem>>, vector<64x64xf32>
    tpu.vector_store %arg3[%c0_27, %c0_28], %120 {strides = array<i32>} : memref<64x64xf32, #tpu.memory_space<vmem>>, vector<64x64xf32>,
    return
  }
  func.func @transform_0(%arg0: i32) -> (i32, i32) {
    %c0_i32 = arith.constant 0 : i32
    %c0_i32_0 = arith.constant 0 : i32
    return %arg0, %c0_i32 : i32, i32
  }
  func.func @transform_1(%arg0: i32) -> (i32, i32) {
    %c0_i32 = arith.constant 0 : i32
    %c0_i32_0 = arith.constant 0 : i32
    return %arg0, %c0_i32 : i32, i32
  }
  func.func @transform_2(%arg0: i32) -> (i32, i32) {
    %c0_i32 = arith.constant 0 : i32
    %c0_i32_0 = arith.constant 0 : i32
    return %arg0, %c0_i32 : i32, i32
  }
}

</mosaic_0001>

<bundles_post_ra>
// kernel: tpu_custom_call.1
= control target key start
LH: loop header
LB: loop body
LE: loop exit
PB: predicated region body
PF: predicated region fallthrough
CT: control target
= control target key end

     0   :  { %s1883_s9 = smov 0   ;;  %s2489_s0 = inlined_call_operand.vmem [shape: f32[128,10], index: 0, kind: input, shape index: {}]   ;;  %s2490_s1 = inlined_call_operand.vmem [shape: f32[128,16], index: 1, kind: input, shape index: {}]   ;;  %s2491_s2 = inlined_call_operand.vmem [shape: f32[128,64], index: 2, kind: output, shape index: {}]  }
   0x1 LB: > { %s1571_s10 = sadd.s32 4294967295, %s1852_s9   ;;  %p1575_p0 = scmp.ge.s32.totalorder %s1852_s9, 1  ;;  %s1852_s9 = sphi %s1883_s9, %s12_s9  }
   0x2   : > { %p124_p1 = scmp.lt.s32.totalorder %s1852_s9, 3 }
   0x4   : > { %p125_p2 = pnand %p1575_p0, %p124_p1 }
   0x6   : > { %128 = sbr.rel (%p125_p2) target bundleno = 659 (0x293), region = 28 }
   0xd   : > { %s1576_s11 = sshll.u32 %s1571_s10, 3  ;;  %v1854_v0 = vmov 3   ;;  %v2494_v1 = vmov 4   ;;  %s1856_s16 = smov 127   ;;  %v185_v8 = vlaneseq  ;;  %vm318_vm1 = vcmask 1046528  }
   0xe   : > { %p152_p3 = scmp.lt.s32.totalorder %s1576_s11, 15  ;;  %1794 = vset.pattern.permute.xlu0 %v1854_v0  ;;  %1790 = vset.pattern.permute.xlu1 %v2494_v1  ;;  %s1857_s17 = smov 15   ;;  %v1858_v20 = vmov 0.0   ;;  %v1859_v48 = vmov 7   ;;  %v1860_v49 = vmov 1   ;;  %v1861_v51 = vmov 5  }
   0xf   : > { %v1938_v11 = vshrl.u32 %v185_v8, 7  ;;  %v2079_v55 = vand.u32 127, %v185_v8  ;;  %v2498_v60 = vmov 1.0|1.0   ;;  %v2500_v8 = vmov 6  }
  0x10   : > { %s2518_s11 = smov (!%p152_p3, %s1576_s11), 15  ;;  %vm400_vm12 = vcmask 121856  }
  0x11   : > { %s1893_s12 = sshll.u32 %s2518_s11, 3  ;;  %v1945_v12 = vadd.s32 8, %v1938_v11  ;;  %v189_v13 = vadd.s32 24, %v1938_v11  ;;  %v191_v18 = vadd.s32 40, %v1938_v11  ;;  %v193_v26 = vadd.s32 56, %v1938_v11 }
  0x12   : > { %s1899_s15 = scalar_lea.vmem %s2490_s1, %s1893_s12  ;;  %s2035_s20 = scalar_lea.vmem %s2489_s0, %s1893_s12  ;;  %v2072_v53 = vmul.u32 2, %v1938_v11  ;;  %vm308_vm11 = vcmp.ne.s32.totalorder %v2079_v55, 15 }
  0x13   : > { %v1902_v2 = vld [vmem:[%s1899_s15 + $0x10] sm:$0xff]  ;;  %v1905_v3 = vld [vmem:[%s1899_s15] sm:$0xff]  ;;  %v1912_v4 = vld [vmem:[%s1899_s15 + $0x18] sm:$0xff]  ;;  %v207_v14 = vand.u32 15, %v1945_v12  ;;  %v221_v15 = vand.u32 15, %v189_v13  ;;  %v235_v25 = vand.u32 15, %v191_v18  ;;  %s2468_s23 = scalar_lea.vmem %s2491_s2, %s1893_s12 }
  0x14   : > { %356 = vrot.lane.b32.xlu1 %v1902_v2, %s1856_s16  ;;  %352 = vrot.lane.b32.xlu0 %v1905_v3, %s1856_s16  ;;  %v1915_v5 = vld [vmem:[%s1899_s15 + $0x8] sm:$0xff]  ;;  %v1925_v7 = vld [vmem:[%s1899_s15 + $0x20] sm:$0xff]  ;;  %v322_v17 = vrot.slane %v1902_v2, 1  ;;  %v319_v19 = vrot.slane %v1905_v3, 1  ;;  %v324_v23 = vrot.slane %v1912_v4, 1  ;;  %v249_v33 = vand.u32 15, %v193_v26 }
  0x15   : > { %v1922_v6 = vld [vmem:[%s1899_s15 + $0x28] sm:$0xff]  ;;  %v1932_v9 = vld [vmem:[%s1899_s15 + $0x38] sm:$0xff]  ;;  %v1935_v10 = vld [vmem:[%s1899_s15 + $0x30] sm:$0xff]  ;;  %v320_v16 = vrot.slane %v1915_v5, 1  ;;  %vm293_vm0 = vcmp.ne.s32.totalorder %v207_v14, 15  ;;  %vm295_vm2 = vcmp.ne.s32.totalorder %v221_v15, 15  ;;  %vm899_vm13 = vcmp.eq.s32.totalorder %v2079_v55, %v2072_v53 }
  0x16   : > { %v301_v21 = vsel %vm293_vm0, 1.0, %v1858_v20  ;;  %v326_v24 = vrot.slane %v1925_v7, 1  ;;  %v303_v28 = vsel %vm295_vm2, 1.0, %v1858_v20  ;;  %v328_v31 = vrot.slane %v1922_v6, 1  ;;  %v2042_v45 = vld [vmem:[%s2035_s20 + $0x8] sm:$0xff]  ;;  %v2047_v46 = vld [vmem:[%s2035_s20 + $0x20] sm:$0xff] }
  0x17   : > { %v323_v22 = vsel %vm318_vm1, %v320_v16, %v322_v17  ;;  %v1978_v29 = vsel %vm318_vm1, %v319_v19, %v320_v16  ;;  %v330_v32 = vrot.slane %v1935_v10, 1  ;;  %vm297_vm3 = vcmp.ne.s32.totalorder %v235_v25, 15  ;;  %v2050_v47 = vld [vmem:[%s2035_s20] sm:$0xff]  ;;  %v2063_v50 = vld [vmem:[%s2035_s20 + $0x10] sm:$0xff]  ;;  %v2069_v52 = vld [vmem:[%s2035_s20 + $0x28] sm:$0xff] }
  0x18   : > { %358 = vrot.lane.b32.xlu1 %v1912_v4, %s1856_s16  ;;  %354 = vrot.lane.b32.xlu0 %v1915_v5, %s1856_s16  ;;  %v1974_v27 = vmul.f32 %v323_v22, %v301_v21  ;;  %v327_v30 = vsel %vm318_vm1, %v324_v23, %v326_v24  ;;  %v1990_v35 = vsel %vm318_vm1, %v322_v17, %v324_v23  ;;  %v305_v36 = vsel %vm297_vm3, 1.0, %v1858_v20  ;;  %v2097_v61 = vld [vmem:[%s2035_s20 + $0x18] sm:$0xff]  ;;  %v2105_v62 = vld [vmem:[%s2035_s20 + $0x30] sm:$0xff] }
  0x19   : > { %v1987_v34 = vmul.f32 %v327_v30, %v303_v28  ;;  %v331_v37 = vsel %vm318_vm1, %v328_v31, %v330_v32  ;;  %v332_v38 = vrot.slane %v1932_v9, 1  ;;  %vm299_vm4 = vcmp.ne.s32.totalorder %v249_v33, 15  ;;  %v2111_v63 = vld [vmem:[%s2035_s20 + $0x38] sm:$0xff] }
  0x1a   : > { %v1999_v39 = vmul.f32 %v331_v37, %v305_v36  ;;  %v2002_v40 = vsel %vm318_vm1, %v326_v24, %v328_v31  ;;  %v307_v41 = vsel %vm299_vm4, 1.0, %v1858_v20  ;;  %v2075_v54 = vmul.u32 2, %v1945_v12 }
  0x1b   : > { %v343_v42 = vsel %vm318_vm1, %v332_v38, %v319_v19  ;;  %v2013_v44 = vsel %vm318_vm1, %v330_v32, %v332_v38  ;;  %v1168_v56 = vadd.s32 32, %v2072_v53  ;;  %v903_v58 = vadd.s32 1, %v2072_v53 }
  0x1c   : > { %362 = vrot.lane.b32.xlu1 %v1922_v6, %s1856_s16  ;;  %360 = vrot.lane.b32.xlu0 %v1925_v7, %s1856_s16  ;;  %v2010_v43 = vmul.f32 %v343_v42, %v307_v41  ;;  %v1169_v57 = vadd.s32 32, %v2075_v54  ;;  %v904_v59 = vadd.s32 1, %v2075_v54  ;;  %v1864_v15 = vmov 0  }
  0x1d   : > { %vm1170_vm5 = vcmp.eq.s32.totalorder %v2079_v55, %v1168_v56  ;;  %vm905_vm8 = vcmp.eq.s32.totalorder %v2079_v55, %v903_v58  ;;  %v2138_v21 = vsel %vm308_vm11, 1.0, %v1858_v20  ;;  %vm900_vm14 = vcmp.eq.s32.totalorder %v2079_v55, %v2075_v54 }
  0x1e   : > { %vm1171_vm6 = vcmp.eq.s32.totalorder %v2079_v55, %v1169_v57  ;;  %vm906_vm9 = vcmp.eq.s32.totalorder %v2079_v55, %v904_v59  ;;  %vm2219_vm15 = vmpackc.low %vm900_vm14, %vm899_vm13  ;;  %vm909_vm3 = vcmask 130048   ;;  %vm1494_vm4 = vcmask 523264  }
  0x1f   : > { %vm1736_vm7 = vmpackc.low %vm1171_vm6, %vm1170_vm5 }
  0x20   : > { %366 = vrot.lane.b32.xlu1 %v1932_v9, %s1856_s16  ;;  %364 = vrot.lane.b32.xlu0 %v1935_v10, %s1856_s16  ;;  %vm1728_vm10 = vmpackc.low %vm906_vm9, %vm905_vm8 }
  0x21   : > { %1737 = vmatprep.subr.msk.bf16.mxu0 %vm1736_vm7, %v2498_v60  ;;  %1729 = vmatprep.subr.msk.bf16.mxu1 %vm1728_vm10, %v2498_v60 }
  0x22   : > { %1739 = vmatpush3.bf16.msk.msra.mxu0 %vm1736_vm7, %v2498_v60  ;;  %1731 = vmatpush3.bf16.msk.msra.mxu1 %vm1728_vm10, %v2498_v60 }
  0x23   : > { %1733 = vmatprep.subr.msk.bf16.mxu1 %vm2219_vm15, %v2498_v60 }
  0x24   : > { %378 = vrot.lane.b32.xlu1 %v1915_v5, %s1857_s17  ;;  %376 = vrot.lane.b32.xlu0 %v1905_v3, %s1857_s17 }
  0x28   : > { %382 = vrot.lane.b32.xlu1 %v1912_v4, %s1857_s17  ;;  %380 = vrot.lane.b32.xlu0 %v1902_v2, %s1857_s17 }
  0x2c   : > { %386 = vrot.lane.b32.xlu1 %v1922_v6, %s1857_s17  ;;  %384 = vrot.lane.b32.xlu0 %v1925_v7, %s1857_s17 }
  0x30   : > { %390 = vrot.lane.b32.xlu1 %v1932_v9, %s1857_s17  ;;  %388 = vrot.lane.b32.xlu0 %v1935_v10, %s1857_s17 }
  0x34   : > { %427 = vrot.lane.b32.xlu1 %v1974_v27, %s1856_s16  ;;  %425 = vrot.lane.b32.xlu0 %v1978_v29, %s1856_s16 }
  0x38   : > { %431 = vrot.lane.b32.xlu1 %v1987_v34, %s1856_s16  ;;  %429 = vrot.lane.b32.xlu0 %v1990_v35, %s1856_s16 }
  0x3c   : > { %435 = vrot.lane.b32.xlu1 %v1999_v39, %s1856_s16  ;;  %433 = vrot.lane.b32.xlu0 %v2002_v40, %s1856_s16 }
  0x40   : > { %439 = vrot.lane.b32.xlu1 %v2010_v43, %s1856_s16  ;;  %437 = vrot.lane.b32.xlu0 %v2013_v44, %s1856_s16 }
  0x44   : > { %451 = vrot.lane.b32.xlu1 %v1974_v27, %s1857_s17  ;;  %449 = vrot.lane.b32.xlu0 %v1978_v29, %s1857_s17 }
  0x48   : > { %455 = vrot.lane.b32.xlu1 %v1987_v34, %s1857_s17  ;;  %453 = vrot.lane.b32.xlu0 %v1990_v35, %s1857_s17 }
  0x4c   : > { %459 = vrot.lane.b32.xlu1 %v1999_v39, %s1857_s17  ;;  %457 = vrot.lane.b32.xlu0 %v2002_v40, %s1857_s17 }
  0x50   : > { %463 = vrot.lane.b32.xlu1 %v2010_v43, %s1857_s17  ;;  %461 = vrot.lane.b32.xlu0 %v2013_v44, %s1857_s17 }
  0x54   : > { %542 = vperm.xlu0 %1794, %v2042_v45   ;;  %496 = vperm.xlu1 %1790, %v2042_v45  }
  0x58   : > { %554 = vperm.xlu0 %1794, %v2047_v46   ;;  %1791 = vset.pattern.permute.xlu1 %v1854_v0 }
  0x59   : > { %538 = vperm.xlu1 %1791, %v2050_v47  }
  0x5c   : > { %1803 = vset.pattern.permute.xlu0 %v1859_v48 }
  0x5d   : > { %670 = vperm.xlu0 %1803, %v2042_v45   ;;  %1792 = vset.pattern.permute.xlu1 %v1860_v49 }
  0x5e   : > { %626 = vperm.xlu1 %1792, %v2050_v47  }
  0x61   : > { %682 = vperm.xlu0 %1803, %v2047_v46  }
  0x62   : > { %1793 = vset.pattern.permute.xlu1 %v1859_v48 }
  0x63   : > { %666 = vperm.xlu1 %1793, %v2050_v47  }
  0x65   : > { %1806 = vset.pattern.permute.xlu0 %v1860_v49 }
  0x66   : > { %634 = vperm.xlu0 %1806, %v2063_v50  }
  0x67   : > { %1795 = vset.pattern.permute.xlu1 %v1861_v51 }
  0x68   : > { %582 = vperm.xlu1 %1795, %v2042_v45  }
  0x6a   : > { %646 = vperm.xlu0 %1806, %v2069_v52  }
  0x6c   : > { %1796 = vset.pattern.permute.xlu1 %v1860_v49 }
  0x6d   : > { %630 = vperm.xlu1 %1796, %v2042_v45  }
  0x6e   : > { %1809 = vset.pattern.permute.xlu0 %v1861_v51 }
  0x6f   : > { %578 = vperm.xlu0 %1809, %v2050_v47  }
  0x71   : > { %1797 = vset.pattern.permute.xlu1 %v1854_v0 }
  0x72   : > { %546 = vperm.xlu1 %1797, %v2063_v50  }
  0x73   : > { %590 = vperm.xlu0 %1809, %v2097_v61  }
  0x76   : > { %1798 = vset.pattern.permute.xlu1 %v1861_v51 }
  0x77   : > { %602 = vperm.xlu0 %1809, %v2105_v62   ;;  %586 = vperm.xlu1 %1798, %v2063_v50  }
  0x7b   : > { %606 = vperm.xlu0 %1809, %v2111_v63   ;;  %1799 = vset.pattern.permute.xlu1 %v1859_v48 }
  0x7c   : > { %674 = vperm.xlu1 %1799, %v2063_v50  }
  0x7f   : > { %1820 = vset.pattern.permute.xlu0 %v2500_v8 }
  0x80   : > { %806 = vperm.xlu0 %1820, %v2042_v45   ;;  %1800 = vset.pattern.permute.xlu1 %v1854_v0 }
  0x81   : > { %550 = vperm.xlu1 %1800, %v2097_v61  }
  0x84   : > { %814 = vperm.xlu0 %1820, %v2097_v61  }
  0x85   : > { %1801 = vset.pattern.permute.xlu1 %v1860_v49 }
  0x86   : > { %v357_v11 = vpop.permute.xlu1 %356  ;;  %v353_v12 = vpop.permute.xlu0 %352  ;;  %638 = vperm.xlu1 %1801, %v2097_v61  }
  0x88   : > { %818 = vperm.xlu0 %1820, %v2047_v46  }
  0x8a   : > { %v2124_v13 = vpop.permute.xlu1 %358  ;;  %v355_v14 = vpop.permute.xlu0 %354  ;;  %1802 = vset.pattern.permute.xlu1 %v1859_v48 }
  0x8b   : > { %678 = vperm.xlu1 %1802, %v2097_v61  }
  0x8c   : > { %1831 = vset.pattern.permute.xlu0 %v1864_v15 }
  0x8d   : > { %714 = vperm.xlu0 %1831, %v2050_v47  }
  0x8e   : > { %v2130_v16 = vpop.permute.xlu1 %362  ;;  %v361_v17 = vpop.permute.xlu0 %360 }
  0x8f   : > { %1804 = vset.pattern.permute.xlu1 %v1861_v51 }
  0x90   : > { %594 = vperm.xlu1 %1804, %v2047_v46  }
  0x91   : > { %718 = vperm.xlu0 %1831, %v2042_v45  }
  0x92   : > { %v367_v18 = vpop.permute.xlu1 %366  ;;  %v365_v19 = vpop.permute.xlu0 %364 }
  0x94   : > { %1805 = vset.pattern.permute.xlu1 %v1860_v49 }
  0x95   : > { %738 = vperm.xlu0 %1831, %v2105_v62   ;;  %642 = vperm.xlu1 %1805, %v2047_v46  }
  0x96   : > { %v379_v22 = vpop.permute.xlu1 %378  ;;  %v377_v23 = vpop.permute.xlu0 %376 }
  0x97   : > { %v402_v24 = vsel %vm400_vm12, %v355_v14, %v379_v22  ;;  %v401_v25 = vsel %vm400_vm12, %v353_v12, %v377_v23  ;;  %v2492_v12 = vmov 8  }
  0x98   : > { %v2145_v26 = vmul.f32 %v401_v25, %v2138_v21  ;;  %v2148_v28 = vmul.f32 %v402_v24, %v2138_v21 }
  0x99   : > { %742 = vperm.xlu0 %1831, %v2111_v63   ;;  %1807 = vset.pattern.permute.xlu1 %v1854_v0 }
  0x9a   : > { %v2152_v20 = vpop.permute.xlu1 %382  ;;  %v381_v30 = vpop.permute.xlu0 %380  ;;  %558 = vperm.xlu1 %1807, %v2069_v52  }
  0x9b   : > { %v403_v31 = vsel %vm400_vm12, %v357_v11, %v381_v30 }
  0x9c   : > { %v2157_v32 = vmul.f32 %v403_v31, %v2138_v21  ;;  %v2496_v31 = vmov 2  }
  0x9d   : > { %1835 = vset.pattern.permute.xlu0 %v2494_v1 }
  0x9e   : > { %v2160_v33 = vpop.permute.xlu1 %386  ;;  %1808 = vset.pattern.permute.xlu1 %v1861_v51  ;;  %v385_v36 = vpop.permute.xlu0 %384  ;;  %491 = vperm.xlu0 %1835, %v2050_v47  }
  0x9f   : > { %598 = vperm.xlu1 %1808, %v2069_v52   ;;  %v405_v37 = vsel %vm400_vm12, %v361_v17, %v385_v36 }
  0xa0   : > { %v2167_v38 = vmul.f32 %v405_v37, %v2138_v21 }
  0xa2   : > { %v391_v41 = vpop.permute.xlu1 %390  ;;  %v389_v42 = vpop.permute.xlu0 %388  ;;  %516 = vperm.xlu0 %1835, %v2069_v52  }
  0xa3   : > { %v408_v56 = vsel %vm400_vm12, %v367_v18, %v391_v41  ;;  %1810 = vset.pattern.permute.xlu1 %v1859_v48  ;;  %v407_v51 = vsel %vm400_vm12, %v365_v19, %v389_v42 }
  0xa4   : > { %686 = vperm.xlu1 %1810, %v2069_v52   ;;  %v2175_v57 = vmul.f32 %v407_v51, %v2138_v21  ;;  %v2178_v58 = vmul.f32 %v408_v56, %v2138_v21 }
  0xa6   : > { %v428_v59 = vpop.permute.xlu1 %427  ;;  %v426_v11 = vpop.permute.xlu0 %425  ;;  %1839 = vset.pattern.permute.xlu0 %v2492_v12 }
  0xa7   : > { %850 = vperm.xlu0 %1839, %v2050_v47  }
  0xa8   : > { %1811 = vset.pattern.permute.xlu1 %v1854_v0 }
  0xa9   : > { %562 = vperm.xlu1 %1811, %v2105_v62  }
  0xaa   : > { %v432_v14 = vpop.permute.xlu1 %431  ;;  %v430_v17 = vpop.permute.xlu0 %429 }
  0xab   : > { %854 = vperm.xlu0 %1839, %v2042_v45  }
  0xad   : > { %1812 = vset.pattern.permute.xlu1 %v1860_v49 }
  0xae   : > { %v436_v18 = vpop.permute.xlu1 %435  ;;  %650 = vperm.xlu1 %1812, %v2105_v62   ;;  %v434_v19 = vpop.permute.xlu0 %433 }
  0xaf   : > { %858 = vperm.xlu0 %1839, %v2063_v50  }
  0xb2   : > { %v440_v22 = vpop.permute.xlu1 %439  ;;  %1813 = vset.pattern.permute.xlu1 %v1859_v48  ;;  %v438_v23 = vpop.permute.xlu0 %437 }
  0xb3   : > { %690 = vperm.xlu1 %1813, %v2105_v62   ;;  %862 = vperm.xlu0 %1839, %v2097_v61  }
  0xb6   : > { %v452_v24 = vpop.permute.xlu1 %451  ;;  %v450_v25 = vpop.permute.xlu0 %449 }
  0xb7   : > { %v474_v30 = vsel %vm400_vm12, %v428_v59, %v452_v24  ;;  %1814 = vset.pattern.permute.xlu1 %v2496_v31  ;;  %v473_v36 = vsel %vm400_vm12, %v426_v11, %v450_v25  ;;  %870 = vperm.xlu0 %1839, %v2069_v52  }
  0xb8   : > { %754 = vperm.xlu1 %1814, %v2050_v47   ;;  %v2197_v37 = vmul.f32 %v473_v36, %v2138_v21  ;;  %v2200_v41 = vmul.f32 %v474_v30, %v2138_v21 }
  0xba   : > { %v456_v42 = vpop.permute.xlu1 %455  ;;  %v454_v56 = vpop.permute.xlu0 %453 }
  0xbb   : > { %v476_v51 = vsel %vm400_vm12, %v432_v14, %v456_v42  ;;  %v475_v59 = vsel %vm400_vm12, %v430_v17, %v454_v56  ;;  %878 = vperm.xlu0 %1839, %v2111_v63  }
  0xbc   : > { %1815 = vset.pattern.permute.xlu1 %v1854_v0  ;;  %v2207_v11 = vmul.f32 %v475_v59, %v2138_v21  ;;  %v2210_v24 = vmul.f32 %v476_v51, %v2138_v21 }
  0xbd   : > { %566 = vperm.xlu1 %1815, %v2111_v63  }
  0xbe   : > { %2502 = vst [vmem:[#allocation2_spill] sm:$0xff] %v2207_v11  ;;  %v460_v25 = vpop.permute.xlu1 %459  ;;  %v458_v30 = vpop.permute.xlu0 %457  ;;  %v2509_v11 = vmov 1.0|1.0  }
  0xbf   : > { %v478_v36 = vsel %vm400_vm12, %v436_v18, %v460_v25  ;;  %v477_v14 = vsel %vm400_vm12, %v434_v19, %v458_v30 }
  0xc0   : > { %v2224_v17 = vmul.f32 %v477_v14, %v2138_v21  ;;  %v2227_v42 = vmul.f32 %v478_v36, %v2138_v21 }
  0xc1   : > { %1816 = vset.pattern.permute.xlu1 %v1860_v49  ;;  %v1311_v49 = vadd.s32 33, %v2072_v53 }
  0xc2   : > { %2505 = vst [vmem:[#allocation3_spill] sm:$0xff] %v2224_v17  ;;  %2506 = vst [vmem:[#allocation4_spill] sm:$0xff] %v2227_v42  ;;  %v464_v18 = vpop.permute.xlu1 %463  ;;  %654 = vperm.xlu1 %1816, %v2111_v63   ;;  %v462_v19 = vpop.permute.xlu0 %461 }
  0xc3   : > { %v480_v56 = vsel %vm400_vm12, %v440_v22, %v464_v18  ;;  %v479_v51 = vsel %vm400_vm12, %v438_v23, %v462_v19  ;;  %v1312_v22 = vadd.s32 33, %v2075_v54  ;;  %vm1313_vm0 = vcmp.eq.s32.totalorder %v2079_v55, %v1311_v49 }
  0xc4   : > { %v2237_v59 = vmul.f32 %v479_v51, %v2138_v21  ;;  %v2240_v25 = vmul.f32 %v480_v56, %v2138_v21 }
  0xc5   : > { %vm1314_vm1 = vcmp.eq.s32.totalorder %v2079_v55, %v1312_v22 }
  0xc6   : > { %1817 = vset.pattern.permute.xlu1 %v1859_v48  ;;  %vm2254_vm2 = vmpackc.low %vm1314_vm1, %vm1313_vm0 }
  0xc7   : > { %694 = vperm.xlu1 %1817, %v2111_v63   ;;  %1741 = vmatprep.subr.msk.bf16.mxu0 %vm2254_vm2, %v2498_v60 }
  0xcb   : > { %1818 = vset.pattern.permute.xlu1 %v2496_v31 }
  0xcc   : > { %758 = vperm.xlu1 %1818, %v2042_v45  }
  0xd0   : > { %1819 = vset.pattern.permute.xlu1 %v2500_v8 }
  0xd1   : > { %802 = vperm.xlu1 %1819, %v2050_v47  }
  0xd3   : > { %v543_v23 = vpop.permute.xlu0 %542  ;;  %v2252_v48 = vpop.permute.xlu1 %496 }
  0xd5   : > { %1821 = vset.pattern.permute.xlu1 %v1864_v15 }
  0xd6   : > { %722 = vperm.xlu1 %1821, %v2063_v50  }
  0xd7   : > { %v2263_v53 = vpop.permute.xlu0 %554 }
  0xd8   : > { %v539_v54 = vpop.permute.xlu1 %538 }
  0xda   : > { %1822 = vset.pattern.permute.xlu1 %v2496_v31 }
  0xdb   : > { %762 = vperm.xlu1 %1822, %v2063_v50  }
  0xdc   : > { %v671_v55 = vpop.permute.xlu0 %670 }
  0xdd   : > { %v627_v36 = vpop.permute.xlu1 %626 }
  0xde   : > { %v657_v19 = vmul.f32 %v627_v36, %v1978_v29  ;;  %v698_v36 = vmul.f32 %v671_v55, %v1915_v5 }
  0xdf   : > { %1823 = vset.pattern.permute.xlu1 %v1864_v15 }
  0xe0   : > { %726 = vperm.xlu1 %1823, %v2097_v61   ;;  %v2269_v14 = vpop.permute.xlu0 %682 }
  0xe2   : > { %v667_v18 = vpop.permute.xlu1 %666 }
  0xe3   : > { %v697_v56 = vmul.f32 %v667_v18, %v1905_v3 }
  0xe4   : > { %1824 = vset.pattern.permute.xlu1 %v2496_v31 }
  0xe5   : > { %766 = vperm.xlu1 %1824, %v2097_v61   ;;  %v635_v51 = vpop.permute.xlu0 %634  ;;  %v705_v49 = vadd.f32 %v697_v56, %v657_v19  ;;  %v569_v19 = vmul.f32 %v539_v54, %v2145_v26 }
  0xe7   : > { %1700 = vmatprep.mubr.msk.f32.mxu0 %vm909_vm3, %v705_v49  ;;  %v583_v22 = vpop.permute.xlu1 %582 }
  0xe8   : > { %v610_v31 = vmul.f32 %v583_v22, %v1915_v5  ;;  %v2510_v22 = vmov 2  }
  0xe9   : > { %1825 = vset.pattern.permute.xlu1 %v2500_v8  ;;  %v2277_v12 = vpop.permute.xlu0 %646  ;;  %v570_v8 = vmul.f32 %v543_v23, %v2148_v28 }
  0xea   : > { %810 = vperm.xlu1 %1825, %v2063_v50  }
  0xeb   : > { %v618_v17 = vadd.f32 %v610_v31, %v570_v8 }
  0xec   : > { %v631_v1 = vpop.permute.xlu1 %630 }
  0xed   : > { %v658_v18 = vmul.f32 %v631_v1, %v1974_v27 }
  0xee   : > { %v579_v60 = vpop.permute.xlu0 %578  ;;  %1826 = vset.pattern.permute.xlu1 %v1864_v15 }
  0xef   : > { %v706_v56 = vadd.f32 %v698_v36, %v658_v18  ;;  %v609_v49 = vmul.f32 %v579_v60, %v1905_v3  ;;  %730 = vperm.xlu1 %1826, %v2047_v46  }
  0xf1   : > { %1701 = vmatmul.mubr.msk.f32.vlgmr.msra.gmra.mrb[0].mxu0 %vm909_vm3, %v706_v56  ;;  %v547_v55 = vpop.permute.xlu1 %546  ;;  %v617_v42 = vadd.f32 %v609_v49, %v569_v19  ;;  %v2511_v49 = vmov 4  }
  0xf2   : > { %v591_v1 = vpop.permute.xlu0 %590  ;;  %1743 = vmatpush3.bf16.msk.msra.mxu0 %vm2254_vm2, %v2509_v11  ;;  %v571_v8 = vmul.f32 %v547_v55, %v2157_v32 }
  0xf3   : > { %1827 = vset.pattern.permute.xlu1 %v2510_v22  ;;  %1668 = vmatprep.mubr.msk.f32.mxu1 %vm909_vm3, %v617_v42  ;;  %v659_v42 = vmul.f32 %v635_v51, %v1990_v35 }
  0xf4   : > { %770 = vperm.xlu1 %1827, %v2047_v46   ;;  %1669 = vmatmul.mubr.msk.f32.vlgmr.msra.gmra.mrb[0].mxu1 %vm909_vm3, %v618_v17 }
  0xf5   : > { %1735 = vmatpush3.bf16.msk.msra.mxu1 %vm2219_vm15, %v2509_v11  ;;  %v404_v11 = vsel %vm400_vm12, %v2124_v13, %v2152_v20 }
  0xf6   : > { %v587_v60 = vpop.permute.xlu1 %586  ;;  %v2299_v23 = vpop.permute.xlu0 %602  ;;  %v412_v51 = vmul.f32 %v404_v11, %v2138_v21 }
  0xf7   : > { %v611_v31 = vmul.f32 %v587_v60, %v1902_v2 }
  0xf8   : > { %1828 = vset.pattern.permute.xlu1 %v1864_v15  ;;  %v612_v15 = vmul.f32 %v591_v1, %v1912_v4 }
  0xf9   : > { %v619_v30 = vadd.f32 %v611_v31, %v571_v8  ;;  %734 = vperm.xlu1 %1828, %v2069_v52  }
  0xfa   : > { %v2306_v54 = vpop.permute.xlu0 %606 }
  0xfb   : > { %1671 = vmatprep.mubr.msk.f32.mxu1 %vm909_vm3, %v619_v30  ;;  %v675_v0 = vpop.permute.xlu1 %674 }
  0xfc   : > { %v699_v17 = vmul.f32 %v675_v0, %v1902_v2  ;;  %v2512_v0 = vmov 6  }
  0xfd   : > { %1829 = vset.pattern.permute.xlu1 %v2510_v22 }
  0xfe   : > { %v707_v36 = vadd.f32 %v699_v17, %v659_v42  ;;  %774 = vperm.xlu1 %1829, %v2069_v52  }
  0xff   : > { %v2316_v18 = vpop.permute.xlu0 %806 }
 0x100   : > { %1703 = vmatprep.mubr.msk.f32.mxu0 %vm909_vm3, %v707_v36  ;;  %v551_v19 = vpop.permute.xlu1 %550 }
 0x101   : > { %v572_v56 = vmul.f32 %v551_v19, %v412_v51 }
 0x102   : > { %1830 = vset.pattern.permute.xlu1 %v2511_v49 }
 0x103   : > { %v620_v13 = vadd.f32 %v612_v15, %v572_v56  ;;  %v815_v20 = vpop.permute.xlu0 %814  ;;  %501 = vperm.xlu1 %1830, %v2063_v50   ;;  %v573_v15 = vmul.f32 %v2263_v53, %v2167_v38  ;;  %v2513_v53 = vmov 8  }
 0x104   : > { %v2322_v55 = vmul.f32 %v815_v20, %v412_v51 }
 0x105   : > { %1672 = vmatmul.mubr.msk.f32.gmra.mrb[2].mxu1 %vm909_vm3, %v620_v13  ;;  %v639_v60 = vpop.permute.xlu1 %638  ;;  %v701_v13 = vmul.f32 %v2269_v14, %v1925_v7 }
 0x106   : > { %v660_v30 = vmul.f32 %v639_v60, %v1987_v34 }
 0x107   : > { %506 = vperm.xlu1 %1830, %v2097_v61   ;;  %v819_v1 = vpop.permute.xlu0 %818 }
 0x108   : > { %v2327_v8 = vmul.f32 %v819_v1, %v2167_v38 }
 0x10a   : > { %v679_v31 = vpop.permute.xlu1 %678 }
 0x10b   : > { %v700_v42 = vmul.f32 %v679_v31, %v1912_v4  ;;  %1832 = vset.pattern.permute.xlu1 %v2512_v0 }
 0x10c   : > { %v2332_v11 = vpop.permute.xlu0 %714  ;;  %822 = vperm.xlu1 %1832, %v2069_v52  }
 0x10d   : > { %v708_v17 = vadd.f32 %v700_v42, %v660_v30 }
 0x10f   : > { %1704 = vmatmul.mubr.msk.f32.gmra.mrb[2].mxu0 %vm909_vm3, %v708_v17  ;;  %v595_v36 = vpop.permute.xlu1 %594  ;;  %v406_v17 = vsel %vm400_vm12, %v2130_v16, %v2160_v33  ;;  %v662_v16 = vmul.f32 %v2277_v12, %v1999_v39 }
 0x110   : > { %v613_v51 = vmul.f32 %v595_v36, %v1925_v7  ;;  %v2339_v19 = vpop.permute.xlu0 %718  ;;  %1833 = vset.pattern.permute.xlu1 %v2510_v22 }
 0x111   : > { %778 = vperm.xlu1 %1833, %v2105_v62  }
 0x112   : > { %v621_v56 = vadd.f32 %v613_v51, %v573_v15 }
 0x114   : > { %v739_v20 = vpop.permute.xlu0 %738  ;;  %1674 = vmatprep.mubr.msk.f32.mxu1 %vm909_vm3, %v621_v56  ;;  %v643_v60 = vpop.permute.xlu1 %642  ;;  %v615_v56 = vmul.f32 %v2299_v23, %v1935_v10 }
 0x115   : > { %v2347_v1 = vmul.f32 %v739_v20, %v2237_v59  ;;  %v661_v38 = vmul.f32 %v643_v60, %v2002_v40  ;;  %1834 = vset.pattern.permute.xlu1 %v2513_v53  ;;  %v2362_v59 = vmul.f32 %v406_v17, %v2138_v21 }
 0x116   : > { %866 = vperm.xlu1 %1834, %v2047_v46  }
 0x117   : > { %v709_v31 = vadd.f32 %v701_v13, %v661_v38 }
 0x118   : > { %v743_v30 = vpop.permute.xlu0 %742 }
 0x119   : > { %v2353_v42 = vmul.f32 %v743_v30, %v2240_v25  ;;  %1706 = vmatprep.mubr.msk.f32.mxu0 %vm909_vm3, %v709_v31  ;;  %v559_v14 = vpop.permute.xlu1 %558 }
 0x11a   : > { %1836 = vset.pattern.permute.xlu1 %v2510_v22  ;;  %v574_v15 = vmul.f32 %v559_v14, %v2362_v59 }
 0x11b   : > { %782 = vperm.xlu1 %1836, %v2111_v63  }
 0x11e   : > { %v599_v36 = vpop.permute.xlu1 %598 }
 0x11f   : > { %v614_v25 = vmul.f32 %v599_v36, %v1922_v6  ;;  %1837 = vset.pattern.permute.xlu1 %v2511_v49 }
 0x120   : > { %511 = vperm.xlu1 %1837, %v2047_v46  }
 0x121   : > { %v622_v51 = vadd.f32 %v614_v25, %v574_v15 }
 0x123   : > { %1675 = vmatmul.mubr.msk.f32.gmra.mrb[4].mxu1 %vm909_vm3, %v622_v51  ;;  %v687_v33 = vpop.permute.xlu1 %686 }
 0x124   : > { %v702_v22 = vmul.f32 %v687_v33, %v1922_v6  ;;  %1838 = vset.pattern.permute.xlu1 %v2512_v0  ;;  %v1867_v0 = vmov 9   ;;  %v834_v33 = vmul.f32 %v2316_v18, %v2148_v28 }
 0x125   : > { %826 = vperm.xlu1 %1838, %v2105_v62   ;;  %1842 = vset.pattern.permute.xlu0 %v1867_v0 }
 0x126   : > { %v710_v21 = vadd.f32 %v702_v22, %v662_v16  ;;  %1455 = vperm.xlu0 %1842, %v2050_v47   ;;  %v616_v47 = vmul.f32 %v2306_v54, %v1932_v9  ;;  %v530_v54 = vmul.f32 %v2252_v48, %v1915_v5  ;;  %v746_v48 = vmul.f32 %v2339_v19, %v2200_v41 }
 0x128   : > { %1707 = vmatmul.mubr.msk.f32.gmra.mrb[4].mxu0 %vm909_vm3, %v710_v21  ;;  %v563_v13 = vpop.permute.xlu1 %562 }
 0x129   : > { %v575_v20 = vmul.f32 %v563_v13, %v2175_v57  ;;  %830 = vperm.xlu1 %1838, %v2111_v63  }
 0x12a   : > { %1467 = vperm.xlu0 %1842, %v2097_v61  }
 0x12b   : > { %v623_v12 = vadd.f32 %v615_v56, %v575_v20 }
 0x12d   : > { %1840 = vset.pattern.permute.xlu1 %v2513_v53  ;;  %1677 = vmatprep.mubr.msk.f32.mxu1 %vm909_vm3, %v623_v12  ;;  %v651_v60 = vpop.permute.xlu1 %650 }
 0x12e   : > { %874 = vperm.xlu1 %1840, %v2105_v62   ;;  %v663_v38 = vmul.f32 %v651_v60, %v2013_v44  ;;  %1475 = vperm.xlu0 %1842, %v2069_v52  }
 0x132   : > { %1841 = vset.pattern.permute.xlu1 %v2511_v49  ;;  %v691_v23 = vpop.permute.xlu1 %690  ;;  %v492_v49 = vpop.permute.xlu0 %491  ;;  %1483 = vperm.xlu0 %1842, %v2111_v63  }
 0x133   : > { %v703_v31 = vmul.f32 %v691_v23, %v1935_v10  ;;  %521 = vperm.xlu1 %1841, %v2105_v62   ;;  %v529_v61 = vmul.f32 %v492_v49, %v1905_v3 }
 0x135   : > { %v711_v53 = vadd.f32 %v703_v31, %v663_v38 }
 0x136   : > { %v2402_v36 = vpop.permute.xlu0 %516 }
 0x137   : > { %526 = vperm.xlu1 %1841, %v2111_v63   ;;  %1709 = vmatprep.mubr.msk.f32.mxu0 %vm909_vm3, %v711_v53  ;;  %v755_v30 = vpop.permute.xlu1 %754 }
 0x13a   : > { %v851_v25 = vpop.permute.xlu0 %850 }
 0x13b   : > { %1843 = vset.pattern.permute.xlu1 %v1867_v0  ;;  %v881_v20 = vmul.f32 %v851_v25, %v1905_v3 }
 0x13c   : > { %v567_v14 = vpop.permute.xlu1 %566  ;;  %1459 = vperm.xlu1 %1843, %v2042_v45  }
 0x13d   : > { %v576_v10 = vmul.f32 %v567_v14, %v2178_v58 }
 0x13f   : > { %v624_v17 = vadd.f32 %v616_v47, %v576_v10 }
 0x140   : > { %1463 = vperm.xlu1 %1843, %v2063_v50  }
 0x141   : > { %1678 = vmatmul.mubr.msk.f32.gmra.mrb[6].mxu1 %vm909_vm3, %v624_v17  ;;  %v655_v52 = vpop.permute.xlu1 %654 }
 0x142   : > { %1684 = vmatprep.mubr.msk.f32.mxu1 %vm909_vm3, %v529_v61  ;;  %v664_v63 = vmul.f32 %v655_v52, %v2010_v43  ;;  %v2515_v52 = vld [vmem:[#allocation3_spill] sm:$0xff] }
 0x144   : > { %1471 = vperm.xlu1 %1843, %v2047_v46   ;;  %v785_v46 = vmul.f32 %v755_v30, %v1978_v29 }
 0x145   : > { %1685 = vmatmul.mubr.msk.f32.vlgmr.msra.gmra.mrb[0].mxu1 %vm909_vm3, %v530_v54 }
 0x146   : > { %v695_v45 = vpop.permute.xlu1 %694 }
 0x147   : > { %v704_v15 = vmul.f32 %v695_v45, %v1932_v9  ;;  %v745_v9 = vmul.f32 %v2332_v11, %v2197_v37 }
 0x148   : > { %1479 = vperm.xlu1 %1843, %v2105_v62   ;;  %v855_v62 = vpop.permute.xlu0 %854 }
 0x149   : > { %v712_v50 = vadd.f32 %v704_v15, %v664_v63  ;;  %v793_v13 = vadd.f32 %v785_v46, %v745_v9  ;;  %v882_v41 = vmul.f32 %v855_v62, %v1915_v5  ;;  %v2514_v5 = vld [vmem:[#allocation2_spill] sm:$0xff] }
 0x14b   : > { %1710 = vmatmul.mubr.msk.f32.gmra.mrb[6].mxu0 %vm909_vm3, %v712_v50  ;;  %v759_v51 = vpop.permute.xlu1 %758 }
 0x14c   : > { %v786_v16 = vmul.f32 %v759_v51, %v1974_v27  ;;  %v859_v18 = vpop.permute.xlu0 %858 }
 0x14d   : > { %v883_v49 = vmul.f32 %v859_v18, %v1902_v2 }
 0x14e   : > { %v794_v22 = vadd.f32 %v786_v16, %v746_v48 }
 0x150   : > { %v842_v21 = vadd.f32 %v834_v33, %v794_v22  ;;  %v803_v56 = vpop.permute.xlu1 %802  ;;  %v863_v31 = vpop.permute.xlu0 %862 }
 0x151   : > { %v833_v12 = vmul.f32 %v803_v56, %v2145_v26  ;;  %v884_v10 = vmul.f32 %v863_v31, %v1912_v4 }
 0x152   : > { %v890_v60 = vadd.f32 %v882_v41, %v842_v21 }
 0x153   : > { %v841_v27 = vadd.f32 %v833_v12, %v793_v13 }
 0x155   : > { %v889_v19 = vadd.f32 %v881_v20, %v841_v27  ;;  %v723_v29 = vpop.permute.xlu1 %722 }
 0x156   : > { %v747_v38 = vmul.f32 %v723_v29, %v2514_v5 }
 0x157   : > { %1716 = vmatprep.mubr.msk.f32.mxu0 %vm909_vm3, %v889_v19 }
 0x158   : > { %1717 = vmatmul.mubr.msk.f32.vlgmr.msra.gmra.mrb[0].mxu0 %vm909_vm3, %v890_v60 }
 0x15a   : > { %v763_v28 = vpop.permute.xlu1 %762 }
 0x15b   : > { %v787_v26 = vmul.f32 %v763_v28, %v1990_v35 }
 0x15d   : > { %v795_v47 = vadd.f32 %v787_v26, %v747_v38 }
 0x15f   : > { %v727_v37 = vpop.permute.xlu1 %726 }
 0x160   : > { %v748_v0 = vmul.f32 %v727_v37, %v2210_v24 }
 0x164   : > { %v767_v11 = vpop.permute.xlu1 %766 }
 0x165   : > { %v788_v3 = vmul.f32 %v767_v11, %v1987_v34 }
 0x167   : > { %v796_v23 = vadd.f32 %v788_v3, %v748_v0  ;;  %v1844_v3 = vld [vmem:[%s1899_s15 + $0x30] sm:$0xff] }
 0x169   : > { %v844_v53 = vadd.f32 %v2322_v55, %v796_v23  ;;  %v811_v30 = vpop.permute.xlu1 %810  ;;  %v1845_v23 = vld [vmem:[%s1899_s15 + $0x38] sm:$0xff] }
 0x16a   : > { %v835_v14 = vmul.f32 %v811_v30, %v2157_v32 }
 0x16b   : > { %v892_v34 = vadd.f32 %v884_v10, %v844_v53 }
 0x16c   : > { %v843_v61 = vadd.f32 %v835_v14, %v795_v47 }
 0x16e   : > { %v891_v24 = vadd.f32 %v883_v49, %v843_v61  ;;  %v731_v17 = vpop.permute.xlu1 %730 }
 0x16f   : > { %v749_v54 = vmul.f32 %v731_v17, %v2515_v52 }
 0x170   : > { %1719 = vmatprep.mubr.msk.f32.mxu0 %vm909_vm3, %v891_v24 }
 0x171   : > { %1720 = vmatmul.mubr.msk.f32.gmra.mrb[2].mxu0 %vm909_vm3, %v892_v34 }
 0x173   : > { %v771_v35 = vpop.permute.xlu1 %770 }
 0x174   : > { %v789_v55 = vmul.f32 %v771_v35, %v2002_v40  ;;  %v2516_v40 = vld [vmem:[#allocation4_spill] sm:$0xff] }
 0x176   : > { %v797_v45 = vadd.f32 %v789_v55, %v749_v54 }
 0x178   : > { %v735_v63 = vpop.permute.xlu1 %734  ;;  %v845_v15 = vadd.f32 %v2327_v8, %v797_v45  ;;  %v871_v8 = vpop.permute.xlu0 %870 }
 0x179   : > { %v750_v22 = vmul.f32 %v735_v63, %v2516_v40 }
 0x17d   : > { %v775_v32 = vpop.permute.xlu1 %774 }
 0x17e   : > { %v790_v46 = vmul.f32 %v775_v32, %v1999_v39 }
 0x180   : > { %v798_v62 = vadd.f32 %v790_v46, %v750_v22 }
 0x182   : > { %v502_v50 = vpop.permute.xlu1 %501 }
 0x183   : > { %v531_v25 = vmul.f32 %v502_v50, %v1902_v2  ;;  %v886_v2 = vmul.f32 %v871_v8, %v1922_v6 }
 0x185   : > { %1687 = vmatprep.mubr.msk.f32.mxu1 %vm909_vm3, %v531_v25 }
 0x186   : > { %v507_v51 = vpop.permute.xlu1 %506 }
 0x187   : > { %v532_v48 = vmul.f32 %v507_v51, %v1912_v4 }
 0x189   : > { %1688 = vmatmul.mubr.msk.f32.gmra.mrb[2].mxu1 %vm909_vm3, %v532_v48 }
 0x18b   : > { %v823_v16 = vpop.permute.xlu1 %822 }
 0x18c   : > { %v838_v9 = vmul.f32 %v823_v16, %v2362_v59  ;;  %v534_v59 = vmul.f32 %v2402_v36, %v1922_v6  ;;  %v879_v6 = vpop.permute.xlu0 %878 }
 0x18d   : > { %v888_v5 = vmul.f32 %v1845_v23, %v879_v6 }
 0x18e   : > { %v846_v21 = vadd.f32 %v838_v9, %v798_v62 }
 0x190   : > { %v779_v33 = vpop.permute.xlu1 %778  ;;  %v894_v4 = vadd.f32 %v886_v2, %v846_v21 }
 0x191   : > { %v791_v29 = vmul.f32 %v779_v33, %v2013_v44 }
 0x193   : > { %v799_v18 = vadd.f32 %v791_v29, %v2347_v1 }
 0x195   : > { %v867_v56 = vpop.permute.xlu1 %866 }
 0x196   : > { %v885_v13 = vmul.f32 %v867_v56, %v1925_v7 }
 0x198   : > { %v893_v20 = vadd.f32 %v885_v13, %v845_v15 }
 0x19a   : > { %1722 = vmatprep.mubr.msk.f32.mxu0 %vm909_vm3, %v893_v20  ;;  %v783_v12 = vpop.permute.xlu1 %782 }
 0x19b   : > { %1723 = vmatmul.mubr.msk.f32.gmra.mrb[4].mxu0 %vm909_vm3, %v894_v4  ;;  %v792_v19 = vmul.f32 %v783_v12, %v2010_v43 }
 0x19f   : > { %v512_v39 = vpop.permute.xlu1 %511 }
 0x1a0   : > { %v533_v41 = vmul.f32 %v512_v39, %v1925_v7  ;;  %v800_v7 = vadd.f32 %v792_v19, %v2353_v42 }
 0x1a2   : > { %1690 = vmatprep.mubr.msk.f32.mxu1 %vm909_vm3, %v533_v41 }
 0x1a3   : > { %1691 = vmatmul.mubr.msk.f32.gmra.mrb[4].mxu1 %vm909_vm3, %v534_v59 }
 0x1a4   : > { %v827_v27 = vpop.permute.xlu1 %826 }
 0x1a5   : > { %v839_v37 = vmul.f32 %v827_v27, %v2175_v57  ;;  %v1456_v14 = vpop.permute.xlu0 %1455 }
 0x1a7   : > { %v847_v0 = vadd.f32 %v839_v37, %v799_v18 }
 0x1a8   : > { %v831_v60 = vpop.permute.xlu1 %830 }
 0x1a9   : > { %v840_v28 = vmul.f32 %v831_v60, %v2178_v58  ;;  %v1468_v52 = vpop.permute.xlu0 %1467 }
 0x1ab   : > { %v848_v36 = vadd.f32 %v840_v28, %v800_v7 }
 0x1ad   : > { %v875_v11 = vpop.permute.xlu1 %874  ;;  %v896_v38 = vadd.f32 %v888_v5, %v848_v36  ;;  %v1476_v48 = vpop.permute.xlu0 %1475 }
 0x1ae   : > { %v887_v26 = vmul.f32 %v1844_v3, %v875_v11 }
 0x1b0   : > { %v895_v43 = vadd.f32 %v887_v26, %v847_v0 }
 0x1b1   : > { %v1484_v13 = vpop.permute.xlu0 %1483 }
 0x1b2   : > { %1725 = vmatprep.mubr.msk.f32.mxu0 %vm909_vm3, %v895_v43  ;;  %v522_v44 = vpop.permute.xlu1 %521 }
 0x1b3   : > { %v535_v58 = vmul.f32 %v1844_v3, %v522_v44  ;;  %1726 = vmatmul.mubr.msk.f32.gmra.mrb[6].mxu0 %vm909_vm3, %v896_v38 }
 0x1b5   : > { %1693 = vmatprep.mubr.msk.f32.mxu1 %vm909_vm3, %v535_v58 }
 0x1b6   : > { %v527_v57 = vpop.permute.xlu1 %526 }
 0x1b7   : > { %v536_v1 = vmul.f32 %v1845_v23, %v527_v57 }
 0x1b9   : > { %1694 = vmatmul.mubr.msk.f32.gmra.mrb[6].mxu1 %vm909_vm3, %v536_v1 }
 0x1bb   : > { %v1460_v30 = vpop.permute.xlu1 %1459 }
 0x1bf   : > { %v1464_v45 = vpop.permute.xlu1 %1463 }
 0x1c3   : > { %v1472_v33 = vpop.permute.xlu1 %1471 }
 0x1c7   : > { %v1480_v4 = vpop.permute.xlu1 %1479 }
 0x218   : > { %v1686_v42 = vpop.f32.mrb[0].mxu1 }
 0x219   : > { %v1129_v31 = vpop.f32.mrb[1].mxu1 }
 0x22b   : > { %v1718_v53 = vpop.f32.mrb[0].mxu0 }
 0x22c   : > { %v1744_v47 = vadd.f32 %v1718_v53, %v1686_v42  ;;  %v1407_v49 = vpop.f32.mrb[1].mxu0 }
 0x22d   : > { %v1745_v10 = vadd.f32 %v1407_v49, %v1129_v31 }
 0x22e   : > { %v1487_v61 = vadd.f32 %v1744_v47, %v1460_v30 }
 0x22f   : > { %v1486_v24 = vadd.f32 %v1745_v10, %v1456_v14 }
 0x230   : > { %1496 = vst.msk [vmem:[%s2468_s23 + $0x8] sm:$0xff] %vm1494_vm4, %v1487_v61 }
 0x231   : > { %1495 = vst.msk [vmem:[%s2468_s23] sm:$0xff] %vm1494_vm4, %v1486_v24 }
 0x244   : > { %v1721_v17 = vpop.f32.mrb[2].mxu0 }
 0x245   : > { %v1417_v34 = vpop.f32.mrb[3].mxu0 }
 0x25c   : > { %v1689_v35 = vpop.f32.mrb[2].mxu1 }
 0x25d   : > { %v1746_v54 = vadd.f32 %v1721_v17, %v1689_v35  ;;  %v1139_v55 = vpop.f32.mrb[3].mxu1 }
 0x25e   : > { %v1747_v63 = vadd.f32 %v1417_v34, %v1139_v55 }
 0x25f   : > { %v1489_v15 = vadd.f32 %v1746_v54, %v1468_v52 }
 0x260   : > { %v1488_v32 = vadd.f32 %v1747_v63, %v1464_v45 }
 0x261   : > { %1498 = vst.msk [vmem:[%s2468_s23 + $0x18] sm:$0xff] %vm1494_vm4, %v1489_v15 }
 0x262   : > { %1497 = vst.msk [vmem:[%s2468_s23 + $0x10] sm:$0xff] %vm1494_vm4, %v1488_v32 }
 0x26e   : > { %v1724_v50 = vpop.f32.mrb[4].mxu0 }
 0x26f   : > { %v1427_v25 = vpop.f32.mrb[5].mxu0 }
 0x276   : > { %v1692_v51 = vpop.f32.mrb[4].mxu1 }
 0x277   : > { %v1748_v16 = vadd.f32 %v1724_v50, %v1692_v51  ;;  %v1149_v46 = vpop.f32.mrb[5].mxu1 }
 0x278   : > { %v1749_v40 = vadd.f32 %v1427_v25, %v1149_v46 }
 0x279   : > { %v1491_v22 = vadd.f32 %v1748_v16, %v1476_v48 }
 0x27a   : > { %v1490_v9 = vadd.f32 %v1749_v40, %v1472_v33 }
 0x27b   : > { %1500 = vst.msk [vmem:[%s2468_s23 + $0x28] sm:$0xff] %vm1494_vm4, %v1491_v22 }
 0x27c   : > { %1499 = vst.msk [vmem:[%s2468_s23 + $0x20] sm:$0xff] %vm1494_vm4, %v1490_v9 }
 0x286   : > { %v1727_v8 = vpop.f32.mrb[6].mxu0 }
 0x287   : > { %v1437_v62 = vpop.f32.mrb[7].mxu0 }
 0x28c   : > { %v1695_v21 = vpop.f32.mrb[6].mxu1 }
 0x28d   : > { %v1750_v2 = vadd.f32 %v1727_v8, %v1695_v21  ;;  %v1159_v56 = vpop.f32.mrb[7].mxu1 }
 0x28e   : > { %v1751_v20 = vadd.f32 %v1437_v62, %v1159_v56 }
 0x28f   : > { %v1493_v12 = vadd.f32 %v1750_v2, %v1484_v13 }
 0x290   : > { %v1492_v39 = vadd.f32 %v1751_v20, %v1480_v4 }
 0x291   : > { %1502 = vst.msk [vmem:[%s2468_s23 + $0x38] sm:$0xff] %vm1494_vm4, %v1493_v12 }
 0x292   : > { %1501 = vst.msk [vmem:[%s2468_s23 + $0x30] sm:$0xff] %vm1494_vm4, %v1492_v39 }
 0x293 PF: > { %s12_s9 = sadd.s32 1, %s1852_s9  }
 0x294   : > { %p9_p4 = scmp.ge.s32.totalorder %s12_s9, 4  }
 0x296   :  { %11 = sbr.rel (!%p9_p4) target bundleno = 1 (0x1), region = 61 }

</bundles_post_ra>
